<compile_context>
chip_gen: v6e
topology: v6e:2x2x1
jax: 0.10.0
libtpu: 0.0.40
codegen_flags: <defaults>
</compile_context>

<pallas_src>
import jax
import jax.numpy as jnp
from jax.experimental import pallas as pl
from jax.experimental.pallas import tpu as pltpu


def _round_up(x, m):
    return ((x + m - 1) // m) * m


def _choose_tile_b(B):
    """Batch tile: one big tile for small/medium batches (amortize per-step
    overhead); for large batches keep >=2 tiles aligned to 256 so the
    'parallel' grid axis can be sharded across both v7x TensorCores."""
    if B <= 1024:
        return _round_up(B, 8)
    return min(1024, _round_up(-(-B // 2), 256))


def critic_kernel(s_ref, a_ref, w1s_ref, w1a_ref, b1_ref, w2_ref, b2_ref,
                  w3_ref, b3_ref, out_ref):
    # fc1 on the fused concat: cat(s, a) @ W1 == s @ W1s + a @ W1a
    h1 = jnp.dot(s_ref[...], w1s_ref[...], preferred_element_type=jnp.float32)
    h1 = h1 + jnp.dot(a_ref[...], w1a_ref[...],
                      preferred_element_type=jnp.float32)
    h1 = jnp.maximum(h1 + b1_ref[...], 0.0)
    # fc2 + relu
    h2 = jnp.dot(h1, w2_ref[...], preferred_element_type=jnp.float32)
    h2 = jnp.maximum(h2 + b2_ref[...], 0.0)
    # q1 head: contract the fc2 axis of w3_row (1, fc2) against h2 (tile_b, fc2)
    # ("q @ k.T" pattern) -> (1, tile_b): lane-dense result, no N=1 matmul and
    # no masked (tile_b, 1) stores.
    q = jax.lax.dot_general(
        w3_ref[...], h2,
        dimension_numbers=(((1,), (1,)), ((), ())),
        preferred_element_type=jnp.float32)
    out_ref[...] = (q + b3_ref[0]).astype(out_ref.dtype)


def critic_forward(state, action, params, *, tile_b=None):
    """CriticNetwork.forward: q1(relu(fc2(relu(fc1(cat[state, action])))))."""
    w1, b1, w2, b2, w3, b3 = params
    B, D_s = state.shape
    _, D_a = action.shape
    fc1_dims = w1.shape[1]
    fc2_dims = w2.shape[1]

    # Split W1 so the concat is fused into the kernel (weights are tiny).
    w1_s = w1[:D_s]
    w1_a = w1[D_s:]
    w3_row = w3.reshape(1, fc2_dims)   # (fc2, 1) -> (1, fc2)
    b3_vec = b3.reshape(1)             # scalar bias -> SMEM

    if tile_b is None:
        tile_b = _choose_tile_b(B)
    # Pad the batch to a multiple of tile_b (rare once tile_b is large).
    Bp = _round_up(B, tile_b)
    if Bp != B:
        pad = Bp - B
        state = jnp.pad(state, ((0, pad), (0, 0)))
        action = jnp.pad(action, ((0, pad), (0, 0)))
    num_tiles = Bp // tile_b

    flops = 2 * Bp * (D_s * fc1_dims + D_a * fc1_dims
                      + fc1_dims * fc2_dims + fc2_dims)
    bytes_accessed = 4 * (Bp * (D_s + D_a + 1)
                          + (D_s + D_a) * fc1_dims + fc1_dims
                          + fc1_dims * fc2_dims + fc2_dims
                          + fc2_dims + 1)

    q_slab = pl.pallas_call(
        critic_kernel,
        out_shape=jax.ShapeDtypeStruct((num_tiles, tile_b), jnp.float32),
        grid_spec=pltpu.PrefetchScalarGridSpec(
            num_scalar_prefetch=0,
            grid=(num_tiles,),
            in_specs=[
                pl.BlockSpec((tile_b, D_s), lambda i: (i, 0)),         # state tile
                pl.BlockSpec((tile_b, D_a), lambda i: (i, 0)),         # action tile
                pl.BlockSpec((D_s, fc1_dims), lambda i: (0, 0)),       # W1 (state rows)
                pl.BlockSpec((D_a, fc1_dims), lambda i: (0, 0)),       # W1 (action rows)
                pl.BlockSpec((1, fc1_dims), lambda i: (0, 0)),         # b1
                pl.BlockSpec((fc1_dims, fc2_dims), lambda i: (0, 0)),  # W2
                pl.BlockSpec((1, fc2_dims), lambda i: (0, 0)),         # b2
                pl.BlockSpec((1, fc2_dims), lambda i: (0, 0)),         # w3 row
                pl.BlockSpec(memory_space=pltpu.MemorySpace.SMEM),     # b3 scalar
            ],
            out_specs=pl.BlockSpec((1, tile_b), lambda i: (i, 0)),     # lane-dense
        ),
        compiler_params=pltpu.CompilerParams(
            dimension_semantics=("parallel",)),
        cost_estimate=pl.CostEstimate(
            flops=flops, transcendentals=0, bytes_accessed=bytes_accessed),
    )(state, action, w1_s, w1_a, b1, w2, b2, w3_row, b3_vec)

    # (num_tiles, tile_b) -> (B, 1)
    return q_slab.reshape(Bp, 1)[:B]


def init_linear_params(key, fan_in, fan_out):
    """Matches nn.Linear default init U(-1/sqrt(fan_in), 1/sqrt(fan_in)).
    Weight stored transposed: (fan_in, fan_out)."""
    kw, kb = jax.random.split(key)
    bound = 1.0 / jnp.sqrt(jnp.float32(fan_in))
    w = jax.random.uniform(kw, (fan_in, fan_out), jnp.float32, -bound, bound)
    b = jax.random.uniform(kb, (1, fan_out), jnp.float32, -bound, bound)
    return w, b


if __name__ == "__main__":
    # Small shapes consistent with the module: state_dim=(24,), n_actions=8,
    # fc1_dims=32, fc2_dims=32, batch=8.
    batch = 8
    state_dim = 24
    n_actions = 8
    fc1_dims = 32
    fc2_dims = 32
    in_dim = state_dim + n_actions

    key = jax.random.PRNGKey(0)
    k_state, k_action, k1, k2, k3 = jax.random.split(key, 5)

    state = jax.random.normal(k_state, (batch, state_dim), jnp.float32)
    action = jax.random.normal(k_action, (batch, n_actions), jnp.float32)

    w1, b1 = init_linear_params(k1, in_dim, fc1_dims)
    w2, b2 = init_linear_params(k2, fc1_dims, fc2_dims)
    w3, b3 = init_linear_params(k3, fc2_dims, 1)
    params = (w1, b1, w2, b2, w3, b3)

    def reference(s, a):
        x = jnp.concatenate([s, a], axis=1)
        h = jnp.maximum(x @ w1 + b1, 0.0)
        h = jnp.maximum(h @ w2 + b2, 0.0)
        return h @ w3 + b3

    # 1) single-tile path
    q1 = jax.block_until_ready(critic_forward(state, action, params))
    ref = reference(state, action)
    assert q1.shape == (batch, 1)
    assert jnp.allclose(q1, ref, atol=1e-4, rtol=1e-4), \
        "mismatch vs reference (single tile)"

    # 2) multi-tile + batch-padding path (batch=13, tile_b=8 -> pad to 16, 2 tiles)
    batch2 = 13
    ks2, ka2 = jax.random.split(jax.random.PRNGKey(1))
    state2 = jax.random.normal(ks2, (batch2, state_dim), jnp.float32)
    action2 = jax.random.normal(ka2, (batch2, n_actions), jnp.float32)
    q2 = jax.block_until_ready(critic_forward(state2, action2, params, tile_b=8))
    ref2 = reference(state2, action2)
    assert q2.shape == (batch2, 1)
    assert jnp.allclose(q2, ref2, atol=1e-4, rtol=1e-4), \
        "mismatch vs reference (multi tile / padded batch)"

    print("KERNEL_OK")
</pallas_src>

<mosaic_0001>
module attributes {stable_mosaic.version = 11 : i64} {
  func.func @critic_kernel(%arg0: i32, %arg1: memref<8x24xf32, #tpu.memory_space<vmem>>, %arg2: memref<8x8xf32, #tpu.memory_space<vmem>>, %arg3: memref<24x32xf32, #tpu.memory_space<vmem>>, %arg4: memref<8x32xf32, #tpu.memory_space<vmem>>, %arg5: memref<1x32xf32, #tpu.memory_space<vmem>>, %arg6: memref<32x32xf32, #tpu.memory_space<vmem>>, %arg7: memref<1x32xf32, #tpu.memory_space<vmem>>, %arg8: memref<1x32xf32, #tpu.memory_space<vmem>>, %arg9: memref<1xf32, #tpu.memory_space<smem>>, %arg10: memref<1x8xf32, #tpu.memory_space<vmem>>) attributes {dimension_semantics = [#tpu.dimension_semantics<parallel>], iteration_bounds = array<i64: 1>, scalar_prefetch = 0 : i64, scratch_operands = 0 : i64, tpu.core_type = #tpu.core_type<tc>, window_params = [{transform_indices = @transform_0, window_bounds = array<i64: 8, 24>}, {transform_indices = @transform_1, window_bounds = array<i64: 8, 8>}, {pipeline_mode = #tpu.pipeline_mode<synchronous>, transform_indices = @transform_2, window_bounds = array<i64: 24, 32>}, {pipeline_mode = #tpu.pipeline_mode<synchronous>, transform_indices = @transform_3, window_bounds = array<i64: 8, 32>}, {pipeline_mode = #tpu.pipeline_mode<synchronous>, transform_indices = @transform_4, window_bounds = array<i64: 1, 32>}, {pipeline_mode = #tpu.pipeline_mode<synchronous>, transform_indices = @transform_5, window_bounds = array<i64: 32, 32>}, {pipeline_mode = #tpu.pipeline_mode<synchronous>, transform_indices = @transform_6, window_bounds = array<i64: 1, 32>}, {pipeline_mode = #tpu.pipeline_mode<synchronous>, transform_indices = @transform_7, window_bounds = array<i64: 1, 32>}, {transform_indices = @transform_8, window_bounds = array<i64: 1>}, {transform_indices = @transform_9, window_bounds = array<i64: 1, 8>}]} {
    %c0 = arith.constant 0 : index
    %c0_0 = arith.constant 0 : index
    %0 = vector.load %arg1[%c0, %c0_0] : memref<8x24xf32, #tpu.memory_space<vmem>>, vector<8x24xf32>
    %c0_1 = arith.constant 0 : index
    %c0_2 = arith.constant 0 : index
    %1 = vector.load %arg3[%c0_1, %c0_2] : memref<24x32xf32, #tpu.memory_space<vmem>>, vector<24x32xf32>
    %cst = arith.constant dense<0.000000e+00> : vector<8x32xf32>
    %2 = tpu.matmul %0, %1, %cst {dimension_numbers = #tpu.dot_dimension_numbers<[1], [0], [0], [1], [0, 0, 1, 1], [], []>} : vector<8x24xf32>, vector<24x32xf32>, vector<8x32xf32> -> vector<8x32xf32>
    %c0_3 = arith.constant 0 : index
    %c0_4 = arith.constant 0 : index
    %3 = vector.load %arg2[%c0_3, %c0_4] : memref<8x8xf32, #tpu.memory_space<vmem>>, vector<8x8xf32>
    %c0_5 = arith.constant 0 : index
    %c0_6 = arith.constant 0 : index
    %4 = vector.load %arg4[%c0_5, %c0_6] : memref<8x32xf32, #tpu.memory_space<vmem>>, vector<8x32xf32>
    %cst_7 = arith.constant dense<0.000000e+00> : vector<8x32xf32>
    %5 = tpu.matmul %3, %4, %cst_7 {dimension_numbers = #tpu.dot_dimension_numbers<[1], [0], [0], [1], [0, 0, 1, 1], [], []>} : vector<8x8xf32>, vector<8x32xf32>, vector<8x32xf32> -> vector<8x32xf32>
    %6 = arith.addf %2, %5 : vector<8x32xf32>
    %c0_8 = arith.constant 0 : index
    %c0_9 = arith.constant 0 : index
    %7 = vector.load %arg5[%c0_8, %c0_9] : memref<1x32xf32, #tpu.memory_space<vmem>>, vector<1x32xf32>
    %8 = vector.broadcast %7 : vector<1x32xf32> to vector<8x32xf32>
    %9 = arith.addf %6, %8 : vector<8x32xf32>
    %cst_10 = arith.constant 0.000000e+00 : f32
    %10 = vector.broadcast %cst_10 : f32 to vector<8x32xf32>
    %11 = arith.maximumf %9, %10 : vector<8x32xf32>
    %c0_11 = arith.constant 0 : index
    %c0_12 = arith.constant 0 : index
    %12 = vector.load %arg6[%c0_11, %c0_12] : memref<32x32xf32, #tpu.memory_space<vmem>>, vector<32x32xf32>
    %cst_13 = arith.constant dense<0.000000e+00> : vector<8x32xf32>
    %13 = tpu.matmul %11, %12, %cst_13 {dimension_numbers = #tpu.dot_dimension_numbers<[1], [0], [0], [1], [0, 0, 1, 1], [], []>} : vector<8x32xf32>, vector<32x32xf32>, vector<8x32xf32> -> vector<8x32xf32>
    %c0_14 = arith.constant 0 : index
    %c0_15 = arith.constant 0 : index
    %14 = vector.load %arg7[%c0_14, %c0_15] : memref<1x32xf32, #tpu.memory_space<vmem>>, vector<1x32xf32>
    %15 = vector.broadcast %14 : vector<1x32xf32> to vector<8x32xf32>
    %16 = arith.addf %13, %15 : vector<8x32xf32>
    %cst_16 = arith.constant 0.000000e+00 : f32
    %17 = vector.broadcast %cst_16 : f32 to vector<8x32xf32>
    %18 = arith.maximumf %16, %17 : vector<8x32xf32>
    %c0_17 = arith.constant 0 : index
    %c0_18 = arith.constant 0 : index
    %19 = vector.load %arg8[%c0_17, %c0_18] : memref<1x32xf32, #tpu.memory_space<vmem>>, vector<1x32xf32>
    %cst_19 = arith.constant dense<0.000000e+00> : vector<1x8xf32>
    %20 = tpu.matmul %19, %18, %cst_19 {dimension_numbers = #tpu.dot_dimension_numbers<[1], [1], [0], [0], [0, 0, 1, 0], [], []>} : vector<1x32xf32>, vector<8x32xf32>, vector<1x8xf32> -> vector<1x8xf32>
    %c0_20 = arith.constant 0 : index
    %21 = memref.load %arg9[%c0_20] : memref<1xf32, #tpu.memory_space<smem>>
    %22 = vector.broadcast %21 : f32 to vector<1x8xf32>
    %23 = arith.addf %20, %22 : vector<1x8xf32>
    %c0_21 = arith.constant 0 : index
    %c0_22 = arith.constant 0 : index
    %24 = vector.load %arg10[%c0_21, %c0_22] : memref<1x8xf32, #tpu.memory_space<vmem>>, vector<1x8xf32>
    tpu.vector_store %arg10[%c0_21, %c0_22], %23 {strides = array<i32>} : memref<1x8xf32, #tpu.memory_space<vmem>>, vector<1x8xf32>,
    return
  }
  func.func @transform_0(%arg0: i32) -> (i32, i32) {
    %c0_i32 = arith.constant 0 : i32
    %c0_i32_0 = arith.constant 0 : i32
    return %arg0, %c0_i32 : i32, i32
  }
  func.func @transform_1(%arg0: i32) -> (i32, i32) {
    %c0_i32 = arith.constant 0 : i32
    %c0_i32_0 = arith.constant 0 : i32
    return %arg0, %c0_i32 : i32, i32
  }
  func.func @transform_2(%arg0: i32) -> (i32, i32) {
    %c0_i32 = arith.constant 0 : i32
    %c0_i32_0 = arith.constant 0 : i32
    %c0_i32_1 = arith.constant 0 : i32
    return %c0_i32, %c0_i32_0 : i32, i32
  }
  func.func @transform_3(%arg0: i32) -> (i32, i32) {
    %c0_i32 = arith.constant 0 : i32
    %c0_i32_0 = arith.constant 0 : i32
    %c0_i32_1 = arith.constant 0 : i32
    return %c0_i32, %c0_i32_0 : i32, i32
  }
  func.func @transform_4(%arg0: i32) -> (i32, i32) {
    %c0_i32 = arith.constant 0 : i32
    %c0_i32_0 = arith.constant 0 : i32
    %c0_i32_1 = arith.constant 0 : i32
    return %c0_i32, %c0_i32_0 : i32, i32
  }
  func.func @transform_5(%arg0: i32) -> (i32, i32) {
    %c0_i32 = arith.constant 0 : i32
    %c0_i32_0 = arith.constant 0 : i32
    %c0_i32_1 = arith.constant 0 : i32
    return %c0_i32, %c0_i32_0 : i32, i32
  }
  func.func @transform_6(%arg0: i32) -> (i32, i32) {
    %c0_i32 = arith.constant 0 : i32
    %c0_i32_0 = arith.constant 0 : i32
    %c0_i32_1 = arith.constant 0 : i32
    return %c0_i32, %c0_i32_0 : i32, i32
  }
  func.func @transform_7(%arg0: i32) -> (i32, i32) {
    %c0_i32 = arith.constant 0 : i32
    %c0_i32_0 = arith.constant 0 : i32
    %c0_i32_1 = arith.constant 0 : i32
    return %c0_i32, %c0_i32_0 : i32, i32
  }
  func.func @transform_8(%arg0: i32) -> i32 {
    %c0_i32 = arith.constant 0 : i32
    %c0_i32_0 = arith.constant 0 : i32
    return %c0_i32 : i32
  }
  func.func @transform_9(%arg0: i32) -> (i32, i32) {
    %c0_i32 = arith.constant 0 : i32
    %c0_i32_0 = arith.constant 0 : i32
    return %arg0, %c0_i32 : i32, i32
  }
}

</mosaic_0001>

<bundles_post_ra>
// kernel: tpu_custom_call.1
= control target key start
LH: loop header
LB: loop body
LE: loop exit
PB: predicated region body
PF: predicated region fallthrough
CT: control target
= control target key end

     0   :  { %15 = vsyncpa [#allocation4], 0  ;;  %s725_s0 = inlined_call_operand.hbm [shape: f32[8,24], index: 0, kind: input, shape index: {}]   ;;  %s726_s1 = inlined_call_operand.hbm [shape: f32[8,8], index: 1, kind: input, shape index: {}]   ;;  %s727_s2 = inlined_call_operand.hbm [shape: f32[24,32], index: 2, kind: input, shape index: {}]   ;;  %s728_s3 = inlined_call_operand.hbm [shape: f32[8,32], index: 3, kind: input, shape index: {}]   ;;  %s729_s4 = inlined_call_operand.vmem [shape: f32[1,32], index: 4, kind: input, shape index: {}]   ;;  %s730_s5 = inlined_call_operand.hbm [shape: f32[32,32], index: 5, kind: input, shape index: {}]   ;;  %s731_s6 = inlined_call_operand.vmem [shape: f32[1,32], index: 6, kind: input, shape index: {}]   ;;  %s732_s7 = inlined_call_operand.vmem [shape: f32[1,32], index: 7, kind: input, shape index: {}]   ;;  %s733_s8 = inlined_call_operand.<no memory space> [shape: f32[1], index: 8, kind: input, shape index: {}]   ;;  %s734_s9 = inlined_call_operand.hbm [shape: f32[1,8], index: 9, kind: output, shape index: {}]  }
   0x1   :  { %16 = vsyncpa [#allocation7], 0 }
   0x2   :  { %17 = vsyncpa [#allocation10], 0 }
   0x3   :  { %18 = vsyncpa [#allocation5], 0  ;;  %s631_s30 = smov [#allocation6]   ;;  %s632_s11 = smov [#allocation9]  }
   0x4   :  { %s35_s10 = sshll.u32 %s631_s30, 4  ;;  %s57_s12 = sshll.u32 %s632_s11, 4  ;;  %s36_s10 = int_to_ptr.vmem [resolvable:$true] %s35_s10  ;;  %s58_s12 = int_to_ptr.vmem [resolvable:$true] %s57_s12 }
   0x5   :  { %s511_s13 = scalar_lea.vmem %s36_s10, 128  ;;  %p516_p1 = scmp.lt.s32.totalorder %s36_s10, %s36_s10 }
   0x6   :  { %p512_p0 = scmp.ne.s32.totalorder %s36_s10, %s511_s13  ;;  %p517_p2 = scmp.lt.s32.totalorder %s511_s13, %s511_s13 }
   0x8   :  { %p518_p3 = por %p517_p2, %p516_p1 }
   0xa   :  { %p519_p4 = pnand %p518_p3, %p512_p0 }
   0xc   :  { %522 = shalt.err (!%p519_p4)
}
   0xd   :  { %38 = dma.hbm_to_vmem [thread:$0]  %s726_s1, 128, %s36_s10, [#allocation7]  }
   0xe   :  { %s531_s16 = scalar_lea.vmem %s58_s12, 128  ;;  %p536_p6 = scmp.lt.s32.totalorder %s58_s12, %s58_s12 }
   0xf   :  { %p532_p5 = scmp.ne.s32.totalorder %s58_s12, %s531_s16  ;;  %p537_p7 = scmp.lt.s32.totalorder %s531_s16, %s531_s16 }
  0x11   :  { %p538_p8 = por %p537_p7, %p536_p6 }
  0x13   :  { %p539_p9 = pnand %p538_p8, %p532_p5 }
  0x15   :  { %542 = shalt.err (!%p539_p9)
}
  0x16   :  { %60 = dma.hbm_to_vmem [thread:$0]  %s728_s3, 128, %s58_s12, [#allocation10]  }
  0x17   :  { %s633_s19 = smov [#allocation3]   ;;  %s634_s21 = smov [#allocation8]  }
  0x18   :  { %s25_s20 = sshll.u32 %s633_s19, 4  ;;  %s44_s22 = sshll.u32 %s634_s21, 4  ;;  %s26_s20 = int_to_ptr.vmem [resolvable:$true] %s25_s20  ;;  %s45_s22 = int_to_ptr.vmem [resolvable:$true] %s44_s22 }
  0x19   :  { %s551_s23 = scalar_lea.vmem %s26_s20, 128  ;;  %p556_p11 = scmp.lt.s32.totalorder %s26_s20, %s26_s20 }
  0x1a   :  { %p552_p10 = scmp.ne.s32.totalorder %s26_s20, %s551_s23  ;;  %p557_p12 = scmp.lt.s32.totalorder %s551_s23, %s551_s23 }
  0x1c   :  { %p558_p13 = por %p557_p12, %p556_p11 }
  0x1e   :  { %p559_p0 = pnand %p558_p13, %p552_p10 }
  0x20   :  { %562 = shalt.err (!%p559_p0)
}
  0x21   :  { %28 = dma.hbm_to_vmem [thread:$0]  %s725_s0, 128, %s26_s20, [#allocation4]  }
  0x22   :  { %s571_s25 = scalar_lea.vmem %s45_s22, 384  ;;  %p576_p2 = scmp.lt.s32.totalorder %s45_s22, %s45_s22 }
  0x23   :  { %p572_p1 = scmp.ne.s32.totalorder %s45_s22, %s571_s25  ;;  %p577_p3 = scmp.lt.s32.totalorder %s571_s25, %s571_s25 }
  0x25   :  { %p578_p4 = por %p577_p3, %p576_p2 }
  0x27   :  { %p579_p5 = pnand %p578_p4, %p572_p1 }
  0x29   :  { %582 = shalt.err (!%p579_p5)
}
  0x2a   :  { %s635_s3 = smov 128   ;;  %s636_s26 = smov 8  }
  0x2b   :  { %50 = dma.hbm_to_vmem [thread:$0]  %s727_s2, 384, %s45_s22, [#allocation7], %s635_s3, %s635_s3, %s636_s26  }
  0x2c   :  { %s637_s29 = smov [#allocation11]  }
  0x2d   :  { %s68_s30 = sshll.u32 %s637_s29, 4  ;;  %s69_s30 = int_to_ptr.vmem [resolvable:$true] %s68_s30 }
  0x2e   :  { %s591_s10 = scalar_lea.vmem %s69_s30, 512  ;;  %p596_p7 = scmp.lt.s32.totalorder %s69_s30, %s69_s30 }
  0x2f   :  { %p592_p6 = scmp.ne.s32.totalorder %s69_s30, %s591_s10  ;;  %p597_p8 = scmp.lt.s32.totalorder %s591_s10, %s591_s10 }
  0x31   :  { %p598_p9 = por %p597_p8, %p596_p7 }
  0x33   :  { %p599_p10 = pnand %p598_p9, %p592_p6 }
  0x35   :  { %602 = shalt.err (!%p599_p10)
}
  0x36   :  { %74 = dma.hbm_to_vmem [thread:$0]  %s730_s5, 512, %s69_s30, [#allocation10], %s635_s3, %s635_s3, %s636_s26  }
  0x37   :  { %623 = dma.done.wait [#allocation4], 128  }
  0x38   :  { %624 = vsyncadd [#allocation4], 4294967168 }
  0x39   :  { %625 = dma.done.wait [#allocation7], 512  }
  0x3a   :  { %626 = vsyncadd [#allocation7], 4294966784 }
  0x3b   :  { %627 = dma.done.wait [#allocation10], 640  }
  0x3c   :  { %628 = vsyncadd [#allocation10], 4294966656  ;;  %v638_v0 = vmov 0.0   ;;  %vm639_vm0 = vmmov 0   ;;  %vm102_vm1 = vcmask 64512   ;;  %v99_v1 = vld [vmem:[#allocation8 + $0x10] sm:$0xff]  ;;  %v347_v25 = vstv %s733_s8 }
  0x3d   :  { %468 = vmatprep.subr.mxu1 %v638_v0  ;;  %463 = vmatprep.subr.mxu0 %v638_v0  ;;  %v101_v2 = vld [vmem:[#allocation9] sm:$0xff]  ;;  %v98_v3 = vld [vmem:[#allocation8 + $0x8] sm:$0xff]  ;;  %v97_v5 = vld [vmem:[#allocation8] sm:$0xff]  ;;  %vm176_vm2 = vcmask 195584   ;;  %vm270_vm3 = vcmask 261120   ;;  %s640_s17 = smov [#allocation12]  }
  0x3e   :  { %465 = vmatprep.mubr.msk.f32.mxu0 %vm639_vm0, %v638_v0  ;;  %474 = vmatprep.mubr.msk.f32.mxu1 %vm639_vm0, %v638_v0  ;;  %v100_v4 = vld [vmem:[#allocation6] sm:$0xff]  ;;  %v96_v6 = vld [vmem:[#allocation3] sm:$0xff]  ;;  %v260_v9 = vld [vmem:[#allocation11 + $0x8] sm:$0xff]  ;;  %s432_s18 = sshll.u32 %s640_s17, 4  ;;  %vm424_vm4 = vcmask 57344   ;;  %s433_s18 = int_to_ptr.vmem [resolvable:$true] %s432_s18 }
  0x3f   :  { %469 = vmatpush3.msra.mxu1 %v99_v1  ;;  %464 = vmatpush3.msra.mxu0 %v101_v2  ;;  %v262_v7 = vld [vmem:[#allocation11 + $0x18] sm:$0xff]  ;;  %v261_v8 = vld [vmem:[#allocation11 + $0x10] sm:$0xff]  ;;  %v259_v10 = vld [vmem:[#allocation11] sm:$0xff]  ;;  %s607_s19 = scalar_lea.vmem %s433_s18, 32  ;;  %p608_p12 = scmp.lt.s32.totalorder %s433_s18, %s433_s18 }
  0x40   :  { %470 = vmatprep.subr.mxu1 %v638_v0  ;;  %466 = vmatmul.mubr.msk.f32.vlgmr.msra.gmra.mxu0 %vm102_vm1, %v100_v4  ;;  %v445_v14 = vld [vmem:[%s729_s4] ss:$0 sm:$0xff] }
  0x41   :  { %471 = vmatpush3.msra.mxu1 %v98_v3  ;;  %477 = vmatprep.subr.mxu0 %v638_v0  ;;  %v446_v19 = vld [vmem:[%s731_s6] ss:$0 sm:$0xff]  ;;  %s603_s6 = scalar_lea.vmem %s433_s18, 16 }
  0x42   :  { %472 = vmatprep.subr.mxu1 %v638_v0  ;;  %485 = vmatprep.mubr.msk.f32.mxu0 %vm639_vm0, %v638_v0  ;;  %v345_v24 = vld [vmem:[%s732_s7] sm:$0x1]  ;;  %p604_p11 = scmp.ne.s32.totalorder %s433_s18, %s603_s6  ;;  %p609_p13 = scmp.lt.s32.totalorder %s607_s19, %s603_s6 }
  0x43   :  { %473 = vmatpush3.msra.mxu1 %v97_v5  ;;  %478 = vmatpush3.msra.mxu0 %v262_v7 }
  0x44   :  { %475 = vmatmul.mubr.msk.f32.vlgmr.msra.gmra.mxu1 %vm176_vm2, %v96_v6  ;;  %488 = vmatprep.subr.mxu1 %v638_v0  ;;  %p610_p0 = por %p609_p13, %p608_p12 }
  0x45   :  { %490 = vmatprep.mubr.msk.f32.mxu1 %vm639_vm0, %v638_v0  ;;  %479 = vmatprep.subr.mxu0 %v638_v0 }
  0x46   :  { %480 = vmatpush3.msra.mxu0 %v261_v8  ;;  %p611_p1 = pnand %p610_p0, %p604_p11 }
  0x47   :  { %481 = vmatprep.subr.mxu0 %v638_v0 }
  0x48   :  { %482 = vmatpush3.msra.mxu0 %v260_v9 }
  0x49   :  { %483 = vmatprep.subr.mxu0 %v638_v0 }
  0x4a   :  { %484 = vmatpush3.msra.mxu0 %v259_v10 }
 0x100   :  { %v172_v11 = vpop.f32.mrf.mxu0 }
 0x102   :  { %v467_v12 = vpop.f32.mrf.mxu0 }
 0x104   :  { %v246_v13 = vpop.f32.mrf.mxu1 }
 0x105   :  { %v247_v15 = vadd.f32 %v246_v13, %v172_v11 }
 0x106   :  { %v476_v16 = vpop.f32.mrf.mxu1 }
 0x107   :  { %v257_v17 = vadd.f32 %v445_v14, %v247_v15 }
 0x109   :  { %v258_v18 = vmax.f32 %v257_v17, 0.0 }
 0x10b   :  { %486 = vmatmul.mubr.msk.f32.vlgmr.msra.gmra.mxu0 %vm270_vm3, %v258_v18 }
 0x1cb   :  { %v340_v20 = vpop.f32.mrf.mxu0 }
 0x1cc   :  { %v341_v21 = vadd.f32 %v446_v19, %v340_v20 }
 0x1cd   :  { %v487_v22 = vpop.f32.mrf.mxu0 }
 0x1ce   :  { %v344_v23 = vmax.f32 %v341_v21, 0.0 }
 0x1d0   :  { %489 = vmatpush3.xpose.msk.msra.mxu1 %vm270_vm3, %v344_v23 }
 0x1d3   :  { %491 = vmatmul.mubr.msk.f32.vlgmr.msra.gmra.mxu1 %vm270_vm3, %v345_v24 }
 0x293   :  { %v420_v26 = vpop.f32.mrf.mxu1 }
 0x294   :  { %v421_v27 = vadd.f32 %v420_v26, %v347_v25 }
 0x295   :  { %v492_v28 = vpop.f32.mrf.mxu1 }
 0x296   :  { %425 = vst.msk [vmem:[#allocation12] sm:$0x1] %vm424_vm4, %v421_v27 }
 0x297   :  { %614 = shalt.err (!%p611_p1)
}
 0x298   :  { %435 = dma.vmem_to_hbm [thread:$0]  %s433_s18, 16, %s734_s9, [#allocation5]  }
 0x299   :  { %629 = dma.done.wait [#allocation5], 16  }
 0x29a   :  { %630 = vsyncadd [#allocation5], 4294967280 }
 0x29b   :  { %439 = vsyncpa [#allocation4], 1 }
 0x29c   :  { %440 = vsyncpa [#allocation7], 1 }
 0x29d   :  { %441 = vsyncpa [#allocation10], 1 }
 0x29e   :  { %442 = vsyncpa [#allocation5], 1 }

</bundles_post_ra>
